<compile_context>
chip_gen: v6e
topology: v6e:2x2x1
jax: 0.10.0
libtpu: 0.0.40
codegen_flags: <defaults>
</compile_context>

<pallas_src>
import functools

import jax
import jax.numpy as jnp
from jax import lax
from jax.experimental import pallas as pl
from jax.experimental.pallas import tpu as pltpu


def _conv_bn_lrelu_kernel(x_ref, w_ref, b_ref, o_ref, *, band_rows, negative_slope):
    # x_ref: (1, 1, band_rows+2, W*Cin)  one input band (1-row halo each side)
    # w_ref: (3, W*Cin, W*Cout)          banded weight, BN scale folded in (f32)
    # b_ref: (1, W*Cout)                 folded BN bias tiled over W (f32)
    # o_ref: (1, band_rows, W*Cout)      lane-dense output band (f32)
    tH = band_rows
    lout = o_ref.shape[-1]
    # Single aligned load of the band, upcast once; slices below are on the
    # f32 value (cheap sublane shifts), feeding 3 lane-dense MXU matmuls.
    xb = x_ref[0, 0].astype(jnp.float32)                    # (tH+2, W*Cin)
    acc = jnp.zeros((tH, lout), jnp.float32)
    for ky in range(3):                                     # 3 MXU pushes
        acc = acc + jnp.dot(xb[ky:ky + tH, :], w_ref[ky],
                            preferred_element_type=jnp.float32)
    y = acc + b_ref[0, :]                                   # folded BatchNorm
    y = jnp.where(y > 0, y, negative_slope * y)             # LeakyReLU(0.01)
    o_ref[0] = y.astype(o_ref.dtype)


def conv_bn_elu_pallas_nhwc(x_nhwc, weight_oihw, gamma, beta, running_mean,
                            running_var, *, eps=1e-5, negative_slope=0.01,
                            band_rows=8, input_dtype=jnp.bfloat16,
                            out_dtype=jnp.float32):
    """NHWC entry point (preferred end-to-end: avoids NCHW<->NHWC transposes)."""
    N, H, W, Cin = x_nhwc.shape
    Cout = weight_oihw.shape[0]
    lin, lout = W * Cin, W * Cout
    f32 = jnp.float32

    # ---- fold eval-mode BatchNorm: scale into the weight, bias separate ----
    scale = gamma.astype(f32) * lax.rsqrt(running_var.astype(f32) + eps)   # (Cout,)
    bias = beta.astype(f32) - running_mean.astype(f32) * scale             # (Cout,)
    wf = weight_oihw.astype(f32) * scale[:, None, None, None]              # (Cout,Cin,3,3)

    # ---- banded weight: WB[ky, wi*Cin+ci, wo*Cout+c] = wf[c,ci,ky,kx]
    #      for wi == wo + kx - 1 (zero elsewhere -> W border handled free) ----
    def _band(ky):
        return sum(jnp.kron(jnp.eye(W, W, k=1 - kx, dtype=f32),
                            wf[:, :, ky, kx].T)
                   for kx in range(3))
    wb = jnp.stack([_band(ky) for ky in range(3)], axis=0)                 # (3, lin, lout)
    bias_lane = jnp.tile(bias, W).reshape(1, lout)                         # (1, lout)

    # ---- H-band layout with 1-row halos (one fused XLA copy, bf16) ----
    if H <= band_rows:
        tH = H
    else:
        tH = max(8, (band_rows // 8) * 8)       # out-tile sublane rule: tH % 8 == 0
    nH = -(-H // tH)
    Hp = nH * tH
    x_flat = x_nhwc.reshape(N, H, lin).astype(input_dtype)                 # (N, H, lin)
    x_padh = jnp.pad(x_flat, ((0, 0), (1, Hp - H + 1), (0, 0)))            # (N, Hp+2, lin)
    rows = jnp.arange(nH)[:, None] * tH + jnp.arange(tH + 2)[None, :]      # (nH, tH+2)
    x_banded = x_padh[:, rows, :]                                          # (N, nH, tH+2, lin)

    kernel = functools.partial(_conv_bn_lrelu_kernel, band_rows=tH,
                               negative_slope=negative_slope)

    out_flat = pl.pallas_call(
        kernel,
        out_shape=jax.ShapeDtypeStruct((N, Hp, lout), out_dtype),
        grid_spec=pltpu.PrefetchScalarGridSpec(
            num_scalar_prefetch=0,
            grid=(N, nH),
            in_specs=[
                pl.BlockSpec((1, 1, tH + 2, lin), lambda n, h: (n, h, 0, 0)),
                pl.BlockSpec((3, lin, lout), lambda n, h: (0, 0, 0)),
                pl.BlockSpec((1, lout), lambda n, h: (0, 0)),
            ],
            out_specs=pl.BlockSpec((1, tH, lout), lambda n, h: (n, h, 0)),
        ),
        compiler_params=pltpu.CompilerParams(
            dimension_semantics=("parallel", "parallel"),   # v7x: shard over 2 TCs
            vmem_limit_bytes=32 * 1024 * 1024,              # explicit budget (safe on v5e/v6e/v7x)
        ),
    )(x_banded, wb, bias_lane)

    return out_flat.reshape(N, Hp, W, Cout)[:, :H]          # (N, H, W, Cout)


def conv_bn_elu_pallas(x_nchw, weight_oihw, gamma, beta, running_mean, running_var,
                       eps=1e-5, negative_slope=0.01, band_rows=8,
                       input_dtype=jnp.bfloat16, out_dtype=jnp.float32):
    """PyTorch-parity entry point (NCHW in / NCHW out)."""
    x_nhwc = jnp.transpose(x_nchw, (0, 2, 3, 1))
    out = conv_bn_elu_pallas_nhwc(
        x_nhwc, weight_oihw, gamma, beta, running_mean, running_var,
        eps=eps, negative_slope=negative_slope, band_rows=band_rows,
        input_dtype=input_dtype, out_dtype=out_dtype)
    return jnp.transpose(out, (0, 3, 1, 2))


def _reference(x_nchw, weight_oihw, gamma, beta, running_mean, running_var,
               eps=1e-5, negative_slope=0.01):
    y = lax.conv_general_dilated(
        x_nchw.astype(jnp.float32), weight_oihw.astype(jnp.float32),
        window_strides=(1, 1), padding=((1, 1), (1, 1)),
        dimension_numbers=("NCHW", "OIHW", "NCHW"))
    scale = gamma / jnp.sqrt(running_var + eps)
    bias = beta - running_mean * scale
    y = y * scale[None, :, None, None] + bias[None, :, None, None]
    return jnp.where(y > 0, y, negative_slope * y)


if __name__ == "__main__":
    key = jax.random.PRNGKey(0)
    N, Cin, Cout, H, W = 2, 4, 8, 16, 16

    k_x, k_w, k_g, k_b, k_m, k_v = jax.random.split(key, 6)
    x = jax.random.normal(k_x, (N, Cin, H, W), jnp.float32)
    weight = jax.random.normal(k_w, (Cout, Cin, 3, 3), jnp.float32) * 0.1
    gamma = 1.0 + 0.1 * jax.random.normal(k_g, (Cout,), jnp.float32)
    beta = 0.1 * jax.random.normal(k_b, (Cout,), jnp.float32)
    running_mean = 0.1 * jax.random.normal(k_m, (Cout,), jnp.float32)
    running_var = jnp.abs(jax.random.normal(k_v, (Cout,), jnp.float32)) + 0.5

    ref = _reference(x, weight, gamma, beta, running_mean, running_var)

    # f32 storage path: exact check against the PyTorch-semantics reference.
    fwd_f32 = jax.jit(functools.partial(conv_bn_elu_pallas, input_dtype=jnp.float32))
    out_f32 = jax.block_until_ready(
        fwd_f32(x, weight, gamma, beta, running_mean, running_var))
    assert out_f32.shape == (N, Cout, H, W)
    assert jnp.allclose(out_f32, ref, atol=1e-4, rtol=1e-4)

    # default path (bf16 activation storage, f32 compute).  Looser tolerance
    # only reflects bf16 quantization of the input activations.
    fwd = jax.jit(conv_bn_elu_pallas)
    out = jax.block_until_ready(
        fwd(x, weight, gamma, beta, running_mean, running_var))
    assert out.shape == (N, Cout, H, W)
    assert jnp.allclose(out, ref, atol=2e-2, rtol=2e-2)

    print("KERNEL_OK")
</pallas_src>

<mosaic_0001>
module attributes {stable_mosaic.version = 11 : i64} {
  func.func @_conv_bn_lrelu_kernel(%arg0: i32, %arg1: i32, %arg2: memref<1x1x10x64xf32, #tpu.memory_space<vmem>>, %arg3: memref<3x64x128xf32, #tpu.memory_space<vmem>>, %arg4: memref<1x128xf32, #tpu.memory_space<vmem>>, %arg5: memref<1x8x128xf32, #tpu.memory_space<vmem>>) attributes {dimension_semantics = [#tpu.dimension_semantics<parallel>, #tpu.dimension_semantics<parallel>], iteration_bounds = array<i64: 2, 2>, scalar_prefetch = 0 : i64, scratch_operands = 0 : i64, tpu.core_type = #tpu.core_type<tc>, window_params = [{transform_indices = @transform_0, window_bounds = array<i64: 1, 1, 10, 64>}, {pipeline_mode = #tpu.pipeline_mode<synchronous>, transform_indices = @transform_1, window_bounds = array<i64: 3, 64, 128>}, {pipeline_mode = #tpu.pipeline_mode<synchronous>, transform_indices = @transform_2, window_bounds = array<i64: 1, 128>}, {transform_indices = @transform_3, window_bounds = array<i64: 1, 8, 128>}]} {
    %c0 = arith.constant 0 : index
    %c0_0 = arith.constant 0 : index
    %c0_1 = arith.constant 0 : index
    %c0_2 = arith.constant 0 : index
    %0 = vector.load %arg2[%c0, %c0_0, %c0_1, %c0_2] : memref<1x1x10x64xf32, #tpu.memory_space<vmem>>, vector<1x1x10x64xf32>
    %1 = vector.shape_cast %0 : vector<1x1x10x64xf32> to vector<10x64xf32>
    %cst = arith.constant 0.000000e+00 : f32
    %2 = vector.broadcast %cst : f32 to vector<8x128xf32>
    %3 = vector.extract_strided_slice %1 {offsets = [0, 0], sizes = [8, 64], strides = [1, 1]} : vector<10x64xf32> to vector<8x64xf32>
    %c0_3 = arith.constant 0 : index
    %c0_4 = arith.constant 0 : index
    %c0_5 = arith.constant 0 : index
    %4 = vector.load %arg3[%c0_3, %c0_4, %c0_5] : memref<3x64x128xf32, #tpu.memory_space<vmem>>, vector<1x64x128xf32>
    %5 = vector.shape_cast %4 : vector<1x64x128xf32> to vector<64x128xf32>
    %cst_6 = arith.constant dense<0.000000e+00> : vector<8x128xf32>
    %6 = tpu.matmul %3, %5, %cst_6 {dimension_numbers = #tpu.dot_dimension_numbers<[1], [0], [0], [1], [0, 0, 1, 1], [], []>} : vector<8x64xf32>, vector<64x128xf32>, vector<8x128xf32> -> vector<8x128xf32>
    %7 = arith.addf %2, %6 : vector<8x128xf32>
    %8 = vector.extract_strided_slice %1 {offsets = [1, 0], sizes = [8, 64], strides = [1, 1]} : vector<10x64xf32> to vector<8x64xf32>
    %c1 = arith.constant 1 : index
    %c0_7 = arith.constant 0 : index
    %c0_8 = arith.constant 0 : index
    %9 = vector.load %arg3[%c1, %c0_7, %c0_8] : memref<3x64x128xf32, #tpu.memory_space<vmem>>, vector<1x64x128xf32>
    %10 = vector.shape_cast %9 : vector<1x64x128xf32> to vector<64x128xf32>
    %cst_9 = arith.constant dense<0.000000e+00> : vector<8x128xf32>
    %11 = tpu.matmul %8, %10, %cst_9 {dimension_numbers = #tpu.dot_dimension_numbers<[1], [0], [0], [1], [0, 0, 1, 1], [], []>} : vector<8x64xf32>, vector<64x128xf32>, vector<8x128xf32> -> vector<8x128xf32>
    %12 = arith.addf %7, %11 : vector<8x128xf32>
    %13 = vector.extract_strided_slice %1 {offsets = [2, 0], sizes = [8, 64], strides = [1, 1]} : vector<10x64xf32> to vector<8x64xf32>
    %c2 = arith.constant 2 : index
    %c0_10 = arith.constant 0 : index
    %c0_11 = arith.constant 0 : index
    %14 = vector.load %arg3[%c2, %c0_10, %c0_11] : memref<3x64x128xf32, #tpu.memory_space<vmem>>, vector<1x64x128xf32>
    %15 = vector.shape_cast %14 : vector<1x64x128xf32> to vector<64x128xf32>
    %cst_12 = arith.constant dense<0.000000e+00> : vector<8x128xf32>
    %16 = tpu.matmul %13, %15, %cst_12 {dimension_numbers = #tpu.dot_dimension_numbers<[1], [0], [0], [1], [0, 0, 1, 1], [], []>} : vector<8x64xf32>, vector<64x128xf32>, vector<8x128xf32> -> vector<8x128xf32>
    %17 = arith.addf %12, %16 : vector<8x128xf32>
    %c0_13 = arith.constant 0 : index
    %c0_14 = arith.constant 0 : index
    %18 = vector.load %arg4[%c0_13, %c0_14] : memref<1x128xf32, #tpu.memory_space<vmem>>, vector<1x128xf32>
    %19 = vector.shape_cast %18 : vector<1x128xf32> to vector<128xf32>
    %20 = vector.shape_cast %19 : vector<128xf32> to vector<1x128xf32>
    %21 = vector.broadcast %20 : vector<1x128xf32> to vector<8x128xf32>
    %22 = arith.addf %17, %21 : vector<8x128xf32>
    %cst_15 = arith.constant 0.000000e+00 : f32
    %23 = vector.broadcast %cst_15 : f32 to vector<8x128xf32>
    %24 = arith.cmpf ogt, %22, %23 : vector<8x128xf32>
    %cst_16 = arith.constant 0.00999999977 : f32
    %25 = vector.broadcast %cst_16 : f32 to vector<8x128xf32>
    %26 = arith.mulf %25, %22 : vector<8x128xf32>
    %27 = arith.select %24, %22, %26 : vector<8x128xi1>, vector<8x128xf32>
    %c0_17 = arith.constant 0 : index
    %c0_18 = arith.constant 0 : index
    %c0_19 = arith.constant 0 : index
    %28 = vector.load %arg5[%c0_17, %c0_18, %c0_19] : memref<1x8x128xf32, #tpu.memory_space<vmem>>, vector<1x8x128xf32>
    %29 = vector.shape_cast %28 : vector<1x8x128xf32> to vector<8x128xf32>
    %30 = vector.shape_cast %27 : vector<8x128xf32> to vector<1x8x128xf32>
    tpu.vector_store %arg5[%c0_17, %c0_18, %c0_19], %30 {strides = array<i32>} : memref<1x8x128xf32, #tpu.memory_space<vmem>>, vector<1x8x128xf32>,
    return
  }
  func.func @transform_0(%arg0: i32, %arg1: i32) -> (i32, i32, i32, i32) {
    %c0_i32 = arith.constant 0 : i32
    %c0_i32_0 = arith.constant 0 : i32
    %c0_i32_1 = arith.constant 0 : i32
    return %arg0, %arg1, %c0_i32, %c0_i32_0 : i32, i32, i32, i32
  }
  func.func @transform_1(%arg0: i32, %arg1: i32) -> (i32, i32, i32) {
    %c0_i32 = arith.constant 0 : i32
    %c0_i32_0 = arith.constant 0 : i32
    %c0_i32_1 = arith.constant 0 : i32
    %c0_i32_2 = arith.constant 0 : i32
    return %c0_i32, %c0_i32_0, %c0_i32_1 : i32, i32, i32
  }
  func.func @transform_2(%arg0: i32, %arg1: i32) -> (i32, i32) {
    %c0_i32 = arith.constant 0 : i32
    %c0_i32_0 = arith.constant 0 : i32
    %c0_i32_1 = arith.constant 0 : i32
    return %c0_i32, %c0_i32_0 : i32, i32
  }
  func.func @transform_3(%arg0: i32, %arg1: i32) -> (i32, i32, i32) {
    %c0_i32 = arith.constant 0 : i32
    %c0_i32_0 = arith.constant 0 : i32
    return %arg0, %arg1, %c0_i32 : i32, i32, i32
  }
}

</mosaic_0001>

<bundles_post_ra>
// kernel: tile.8
= control target key start
LH: loop header
LB: loop body
LE: loop exit
PB: predicated region body
PF: predicated region fallthrough
CT: control target
= control target key end

     0   :  { %s28_s0 = inlined_call_operand.vmem [shape: f32[8], index: 0, kind: input, shape index: {}]   ;;  %s29_s1 = inlined_call_operand.vmem [shape: f32[16,8], index: 1, kind: output, shape index: {}]  }
   0x1   :  { %v4_v0 = vld [vmem:[%s28_s0] ss:$0 sm:$0xff] }
   0x2   :  { %5 = vst [vmem:[%s29_s1] sm:$0xff] %v4_v0  ;;  %8 = vst [vmem:[%s29_s1 + $0x8] sm:$0xff] %v4_v0 }

// kernel: tile.9
= control target key start
LH: loop header
LB: loop body
LE: loop exit
PB: predicated region body
PF: predicated region fallthrough
CT: control target
= control target key end

     0   :  { %s133_s10 = smov 120   ;;  %s134_s11 = smov 104   ;;  %vm3_vm0 = vcmask 64512   ;;  %vm9_vm1 = vcmask 1048512   ;;  %vm15_vm2 = vcmask 982912   ;;  %vm21_vm3 = vcmask 917312   ;;  %s209_s0 = inlined_call_operand.vmem [shape: f32[16,8], index: 0, kind: input, shape index: {}]   ;;  %s210_s1 = inlined_call_operand.vmem [shape: f32[1,128], index: 1, kind: output, shape index: {}]  }
   0x1   :  { %v103_v0 = vld [vmem:[%s209_s0 + $0xf] sm:$0x1]   ;;  %v105_v1 = vld [vmem:[%s209_s0 + $0xd] sm:$0x1]   ;;  %v104_v2 = vld [vmem:[%s209_s0 + $0xe] sm:$0x1]  }
   0x2   :  { %7 = vrot.lane.b32.xlu0 %v103_v0, %s133_s10  ;;  %19 = vrot.lane.b32.xlu1 %v105_v1, %s134_s11  ;;  %v106_v3 = vld [vmem:[%s209_s0 + $0xc] sm:$0x1]   ;;  %s135_s16 = smov 112   ;;  %s136_s17 = smov 96   ;;  %v107_v4 = vld [vmem:[%s209_s0 + $0xb] sm:$0x1]  }
   0x3   :  { %v108_v5 = vld [vmem:[%s209_s0 + $0xa] sm:$0x1]   ;;  %v2_v6 = vld [vmem:[%s209_s0] sm:$0x1]   ;;  %s137_s24 = smov 88   ;;  %s138_s25 = smov 80  }
   0x4   :  { %4 = vst.msk [vmem:[#allocation0] sm:$0x1] %vm3_vm0, %v2_v6   ;;  %v109_v7 = vld [vmem:[%s209_s0 + $0x9] sm:$0x1]   ;;  %v110_v8 = vld [vmem:[%s209_s0 + $0x8] sm:$0x1]  }
   0x5   :  { %s139_s30 = smov 72   ;;  %s140_s2 = smov 64   ;;  %v111_v9 = vld [vmem:[%s209_s0 + $0x7] sm:$0x1]   ;;  %v112_v10 = vld [vmem:[%s209_s0 + $0x6] sm:$0x1]  }
   0x6   :  { %13 = vrot.lane.b32.xlu0 %v104_v2, %s135_s16  ;;  %25 = vrot.lane.b32.xlu1 %v106_v3, %s136_s17  ;;  %s141_s7 = smov 56   ;;  %s142_s8 = smov 48   ;;  %v113_v11 = vld [vmem:[%s209_s0 + $0x5] sm:$0x1]   ;;  %v114_v12 = vld [vmem:[%s209_s0 + $0x4] sm:$0x1]  }
   0x7   :  { %s143_s13 = smov 40   ;;  %s144_s14 = smov 32   ;;  %v115_v13 = vld [vmem:[%s209_s0 + $0x3] sm:$0x1]   ;;  %v116_v14 = vld [vmem:[%s209_s0 + $0x2] sm:$0x1]  }
   0x8   :  { %s145_s19 = smov 24   ;;  %s146_s20 = smov 16   ;;  %v117_v15 = vld [vmem:[%s209_s0 + $0x1] sm:$0x1]   ;;  %vm27_vm4 = vcmask 851712   ;;  %vm33_vm5 = vcmask 786112  }
   0x9   :  { %s147_s0 = smov 8   ;;  %vm39_vm6 = vcmask 720512   ;;  %vm45_vm7 = vcmask 654912   ;;  %vm51_vm8 = vcmask 589312   ;;  %vm57_vm9 = vcmask 523712  }
   0xa   :  { %31 = vrot.lane.b32.xlu0 %v107_v4, %s137_s24  ;;  %37 = vrot.lane.b32.xlu1 %v108_v5, %s138_s25  ;;  %vm63_vm10 = vcmask 458112   ;;  %vm69_vm11 = vcmask 392512   ;;  %vm75_vm12 = vcmask 326912   ;;  %vm81_vm13 = vcmask 261312  }
   0xb   :  { %vm87_vm14 = vcmask 195712   ;;  %vm93_vm15 = vcmask 130112  }
   0xe   :  { %43 = vrot.lane.b32.xlu0 %v109_v7, %s139_s30  ;;  %49 = vrot.lane.b32.xlu1 %v110_v8, %s140_s2 }
  0x12   :  { %55 = vrot.lane.b32.xlu0 %v111_v9, %s141_s7  ;;  %61 = vrot.lane.b32.xlu1 %v112_v10, %s142_s8 }
  0x16   :  { %67 = vrot.lane.b32.xlu0 %v113_v11, %s143_s13  ;;  %73 = vrot.lane.b32.xlu1 %v114_v12, %s144_s14 }
  0x1a   :  { %79 = vrot.lane.b32.xlu0 %v115_v13, %s145_s19  ;;  %85 = vrot.lane.b32.xlu1 %v116_v14, %s146_s20 }
  0x1e   :  { %91 = vrot.lane.b32.xlu0 %v117_v15, %s147_s0 }
  0x74   :  { %v8_v16 = vpop.permute.xlu0 %7   ;;  %v20_v17 = vpop.permute.xlu1 %19  }
  0x75   :  { %10 = vst.msk [vmem:[#allocation0] sm:$0x1] %vm9_vm1, %v8_v16  }
  0x78   :  { %v14_v18 = vpop.permute.xlu0 %13   ;;  %v26_v19 = vpop.permute.xlu1 %25  }
  0x79   :  { %16 = vst.msk [vmem:[#allocation0] sm:$0x1] %vm15_vm2, %v14_v18  }
  0x7a   :  { %22 = vst.msk [vmem:[#allocation0] sm:$0x1] %vm21_vm3, %v20_v17  }
  0x7b   :  { %28 = vst.msk [vmem:[#allocation0] sm:$0x1] %vm27_vm4, %v26_v19  }
  0x7c   :  { %v32_v20 = vpop.permute.xlu0 %31   ;;  %v38_v21 = vpop.permute.xlu1 %37  }
  0x7d   :  { %34 = vst.msk [vmem:[#allocation0] sm:$0x1] %vm33_vm5, %v32_v20  }
  0x7e   :  { %40 = vst.msk [vmem:[#allocation0] sm:$0x1] %vm39_vm6, %v38_v21  }
  0x80   :  { %v44_v22 = vpop.permute.xlu0 %43   ;;  %v50_v23 = vpop.permute.xlu1 %49  }
  0x81   :  { %46 = vst.msk [vmem:[#allocation0] sm:$0x1] %vm45_vm7, %v44_v22  }
  0x82   :  { %52 = vst.msk [vmem:[#allocation0] sm:$0x1] %vm51_vm8, %v50_v23  }
  0x84   :  { %v56_v24 = vpop.permute.xlu0 %55   ;;  %v62_v25 = vpop.permute.xlu1 %61  }
  0x85   :  { %58 = vst.msk [vmem:[#allocation0] sm:$0x1] %vm57_vm9, %v56_v24  }
  0x86   :  { %64 = vst.msk [vmem:[#allocation0] sm:$0x1] %vm63_vm10, %v62_v25  }
  0x88   :  { %v68_v26 = vpop.permute.xlu0 %67   ;;  %v74_v27 = vpop.permute.xlu1 %73  }
  0x89   :  { %70 = vst.msk [vmem:[#allocation0] sm:$0x1] %vm69_vm11, %v68_v26  }
  0x8a   :  { %76 = vst.msk [vmem:[#allocation0] sm:$0x1] %vm75_vm12, %v74_v27  }
  0x8c   :  { %v80_v28 = vpop.permute.xlu0 %79   ;;  %v86_v29 = vpop.permute.xlu1 %85  }
  0x8d   :  { %82 = vst.msk [vmem:[#allocation0] sm:$0x1] %vm81_vm13, %v80_v28  }
  0x8e   :  { %88 = vst.msk [vmem:[#allocation0] sm:$0x1] %vm87_vm14, %v86_v29  }
  0x90   :  { %v92_v30 = vpop.permute.xlu0 %91  }
  0x91   :  { %94 = vst.msk [vmem:[#allocation0] sm:$0x1] %vm93_vm15, %v92_v30  }
  0x98   :  { %v99_v31 = vld [vmem:[#allocation0] sm:$0x1] }
  0x99   :  { %102 = vst [vmem:[%s210_s1] sm:$0x1] %v99_v31 }

// kernel: conv_bn_elu_pallas.1
= control target key start
LH: loop header
LB: loop body
LE: loop exit
PB: predicated region body
PF: predicated region fallthrough
CT: control target
= control target key end

     0   :  { %s782_s12 = smov 0   ;;  %s784_s13 = smov 0   ;;  %s950_s0 = inlined_call_operand.vmem [shape: f32[2,2,10,64], index: 0, kind: input, shape index: {}]   ;;  %s951_s1 = inlined_call_operand.vmem [shape: f32[3,64,128], index: 1, kind: input, shape index: {}]   ;;  %s952_s2 = inlined_call_operand.vmem [shape: f32[1,128], index: 2, kind: input, shape index: {}]   ;;  %s953_s3 = inlined_call_operand.vmem [shape: f32[2,16,128], index: 3, kind: output, shape index: {}]  }
   0x1   :  { %s786_s14 = smov 0   ;;  %s788_s15 = smov 0  }
   0x2   :  { %s790_s16 = smov 0  }
   0x3 LB: > { %s22_s17 = sadd.s32 1, %s750_s14  ;;  %s25_s18 = sadd.s32 1, %s754_s15  ;;  %s758_s16 = sphi %s790_s16, %s13_s16   ;;  %s754_s15 = sphi %s788_s15, %s957_s15   ;;  %s750_s14 = sphi %s786_s14, %s956_s14   ;;  %s746_s13 = sphi %s784_s13, %s955_s13   ;;  %s742_s12 = sphi %s782_s12, %s954_s12  }
   0x4   : > { %p23_p0 = scmp.ge.s32.totalorder %s22_s17, 2  ;;  %p566_p1 = scmp.ge.s32.totalorder %s758_s16, 1 }
   0x5   : > { %p157_p2 = scmp.lt.s32.totalorder %s758_s16, 5 }
   0x6   : > { %s959_s17 = smov (%p23_p0, %s22_s17), 0  ;;  %s961_s18 = smov (!%p23_p0, %s25_s18), %s754_s15 }
   0x7   : > { %p158_p3 = pnand %p566_p1, %p157_p2  ;;  %p27_p4 = scmp.ge.s32.totalorder %s961_s18, 2 }
   0x8   : > { %p188_p5 = scmp.lt.s32.totalorder (!%p158_p3), %s746_s13, 1  ;;  %p190_p6 = scmp.lt.s32.totalorder (!%p158_p3), %s742_s12, 1 }
   0x9   : > { %s963_s18 = smov (%p27_p4, %s961_s18), 0  ;;  %161 = sbr.rel (%p158_p3) target bundleno = 249 (0xf9), region = 32 }
   0xe   : > { %v579_v0 = vld [vmem:[%s951_s1 + $0x78] sm:$0xff]  ;;  %v760_v2 = vmov 0.0   ;;  %v578_v3 = vld [vmem:[%s951_s1 + $0x70] sm:$0xff]  ;;  %s965_s13 = smov (!%p188_p5, %s746_s13), 1  ;;  %v577_v5 = vld [vmem:[%s951_s1 + $0x68] sm:$0xff]  ;;  %s967_s12 = smov (!%p190_p6, %s742_s12), 1 }
   0xf   : > { %v214_v1 = vld [vmem:[%s951_s1 + $0x38] sm:$0xff]  ;;  %621 = vmatprep.subr.mxu0 %v760_v2  ;;  %640 = vmatprep.subr.mxu1 %v760_v2  ;;  %v213_v4 = vld [vmem:[%s951_s1 + $0x30] sm:$0xff]  ;;  %v212_v6 = vld [vmem:[%s951_s1 + $0x28] sm:$0xff]  ;;  %s568_s4 = sshll.u32 %s965_s13, 2  ;;  %s567_s9 = sshll.u32 %s967_s12, 1  ;;  %vm226_vm0 = vcmask 1046528  }
  0x10   : > { %622 = vmatpush3.msra.mxu0 %v579_v0  ;;  %641 = vmatpush3.msra.mxu1 %v214_v1  ;;  %v576_v7 = vld [vmem:[%s951_s1 + $0x60] sm:$0xff]  ;;  %s194_s10 = sadd.s32 %s568_s4, %s567_s9  ;;  %v575_v9 = vld [vmem:[%s951_s1 + $0x58] sm:$0xff]  ;;  %v574_v11 = vld [vmem:[%s951_s1 + $0x50] sm:$0xff]  ;;  %vm230_vm1 = vcmask 523264   ;;  %vm761_vm2 = vmmov 0   ;;  %vm384_vm3 = vcmask 1045504  }
  0x11   : > { %623 = vmatprep.subr.mxu0 %v760_v2  ;;  %642 = vmatprep.subr.mxu1 %v760_v2  ;;  %v211_v8 = vld [vmem:[%s951_s1 + $0x20] sm:$0xff]  ;;  %v210_v10 = vld [vmem:[%s951_s1 + $0x18] sm:$0xff]  ;;  %s569_s22 = sshll.u32 %s194_s10, 3  ;;  %v209_v12 = vld [vmem:[%s951_s1 + $0x10] sm:$0xff]  ;;  %s570_s7 = sshll.u32 %s965_s13, 1 }
  0x12   : > { %624 = vmatpush3.msra.mxu0 %v578_v3  ;;  %643 = vmatpush3.msra.mxu1 %v213_v4  ;;  %s196_s27 = scalar_lea.vmem %s950_s0, %s569_s22  ;;  %v573_v17 = vld [vmem:[%s951_s1 + $0x48] sm:$0xff]  ;;  %v572_v19 = vld [vmem:[%s951_s1 + $0x40] sm:$0xff]  ;;  %v589_v22 = vld [vmem:[%s951_s1 + $0xb8] sm:$0xff]  ;;  %s202_s8 = sadd.s32 %s570_s7, %s967_s12 }
  0x13   : > { %625 = vmatprep.subr.mxu0 %v760_v2  ;;  %644 = vmatprep.subr.mxu1 %v760_v2  ;;  %v205_v13 = vld [vmem:[%s196_s27] sm:$0xff]  ;;  %v206_v14 = vld [vmem:[%s196_s27 + $0x8] sm:$0x3]  ;;  %v588_v23 = vld [vmem:[%s951_s1 + $0xb0] sm:$0xff]  ;;  %s571_s11 = sshll.u32 %s202_s8, 3 }
  0x14   : > { %626 = vmatpush3.msra.mxu0 %v577_v5  ;;  %645 = vmatpush3.msra.mxu1 %v212_v6  ;;  %v227_v15 = vrot.slane %v205_v13, 1  ;;  %v228_v16 = vrot.slane %v206_v14, 1  ;;  %v208_v18 = vld [vmem:[%s951_s1 + $0x8] sm:$0xff]  ;;  %v207_v21 = vld [vmem:[%s951_s1] sm:$0xff]  ;;  %v585_v26 = vld [vmem:[%s951_s1 + $0x98] sm:$0xff]  ;;  %v386_v28 = vrot.slane %v206_v14, 2  ;;  %s204_s21 = scalar_lea.vmem %s953_s3, %s571_s11 }
  0x15   : > { %627 = vmatprep.subr.mxu0 %v760_v2  ;;  %646 = vmatprep.subr.mxu1 %v760_v2  ;;  %v587_v24 = vld [vmem:[%s951_s1 + $0xa8] sm:$0xff]  ;;  %v586_v25 = vld [vmem:[%s951_s1 + $0xa0] sm:$0xff]  ;;  %v584_v27 = vld [vmem:[%s951_s1 + $0x90] sm:$0xff]  ;;  %v385_v29 = vrot.slane %v205_v13, 2 }
  0x16   : > { %628 = vmatpush3.msra.mxu0 %v576_v7  ;;  %647 = vmatpush3.msra.mxu1 %v211_v8  ;;  %v229_v20 = vsel %vm226_vm0, %v227_v15, %v228_v16  ;;  %v583_v30 = vld [vmem:[%s951_s1 + $0x88] sm:$0xff]  ;;  %v582_v31 = vld [vmem:[%s951_s1 + $0x80] sm:$0xff] }
  0x17   : > { %629 = vmatprep.subr.mxu0 %v760_v2  ;;  %648 = vmatprep.subr.mxu1 %v760_v2  ;;  %v387_v32 = vsel %vm384_vm3, %v385_v29, %v386_v28  ;;  %v591_v39 = vld [vmem:[%s952_s2] ss:$0 sm:$0xff] }
  0x18   : > { %630 = vmatpush3.msra.mxu0 %v575_v9  ;;  %649 = vmatpush3.msra.mxu1 %v210_v10 }
  0x19   : > { %631 = vmatprep.subr.mxu0 %v760_v2  ;;  %650 = vmatprep.subr.mxu1 %v760_v2 }
  0x1a   : > { %632 = vmatpush3.msra.mxu0 %v574_v11  ;;  %651 = vmatpush3.msra.mxu1 %v209_v12 }
  0x1b   : > { %633 = vmatprep.subr.mxu0 %v760_v2  ;;  %652 = vmatprep.subr.mxu1 %v760_v2 }
  0x1c   : > { %634 = vmatpush3.msra.mxu0 %v573_v17  ;;  %653 = vmatpush3.msra.mxu1 %v208_v18 }
  0x1d   : > { %635 = vmatprep.subr.mxu0 %v760_v2  ;;  %637 = vmatprep.mubr.msk.f32.mxu0 %vm761_vm2, %v760_v2 }
  0x1e   : > { %636 = vmatpush3.msra.mxu0 %v572_v19  ;;  %654 = vmatprep.subr.mxu1 %v760_v2 }
  0x1f   : > { %638 = vmatmul.mubr.msk.f32.vlgmr.msra.gmra.mxu0 %vm230_vm1, %v229_v20  ;;  %655 = vmatpush3.msra.mxu1 %v207_v21 }
  0x20   : > { %656 = vmatprep.mubr.msk.f32.mxu1 %vm761_vm2, %v760_v2  ;;  %659 = vmatprep.subr.mxu0 %v760_v2 }
  0x21   : > { %657 = vmatmul.mubr.msk.f32.vlgmr.msra.gmra.mxu1 %vm230_vm1, %v205_v13  ;;  %660 = vmatpush3.msra.mxu0 %v589_v22 }
  0x22   : > { %661 = vmatprep.subr.mxu0 %v760_v2  ;;  %675 = vmatprep.mubr.msk.f32.mxu0 %vm761_vm2, %v760_v2 }
  0x23   : > { %662 = vmatpush3.msra.mxu0 %v588_v23 }
  0x24   : > { %663 = vmatprep.subr.mxu0 %v760_v2 }
  0x25   : > { %664 = vmatpush3.msra.mxu0 %v587_v24 }
  0x26   : > { %665 = vmatprep.subr.mxu0 %v760_v2 }
  0x27   : > { %666 = vmatpush3.msra.mxu0 %v586_v25 }
  0x28   : > { %667 = vmatprep.subr.mxu0 %v760_v2 }
  0x29   : > { %668 = vmatpush3.msra.mxu0 %v585_v26 }
  0x2a   : > { %669 = vmatprep.subr.mxu0 %v760_v2 }
  0x2b   : > { %670 = vmatpush3.msra.mxu0 %v584_v27 }
  0x2c   : > { %671 = vmatprep.subr.mxu0 %v760_v2 }
  0x2d   : > { %672 = vmatpush3.msra.mxu0 %v583_v30 }
  0x2e   : > { %673 = vmatprep.subr.mxu0 %v760_v2 }
  0x2f   : > { %674 = vmatpush3.msra.mxu0 %v582_v31 }
  0x30   : > { %676 = vmatmul.mubr.msk.f32.vlgmr.msra.gmra.mxu0 %vm230_vm1, %v387_v32 }
  0xdf   : > { %v299_v33 = vpop.f32.mrf.mxu0 }
  0xe1   : > { %v371_v34 = vpop.f32.mrf.mxu1  ;;  %v639_v35 = vpop.f32.mrf.mxu0 }
  0xe2   : > { %v372_v37 = vadd.f32 %v371_v34, %v299_v33 }
  0xe3   : > { %v658_v36 = vpop.f32.mrf.mxu1 }
  0xf0   : > { %v456_v38 = vpop.f32.mrf.mxu0 }
  0xf1   : > { %v460_v40 = vadd.f32 %v456_v38, %v372_v37 }
  0xf2   : > { %v677_v41 = vpop.f32.mrf.mxu0 }
  0xf3   : > { %v468_v42 = vadd.f32 %v591_v39, %v460_v40 }
  0xf5   : > { %vm469_vm4 = vcmp.gt.f32.partialorder %v468_v42, 0.0  ;;  %v470_v43 = vmul.f32 0.01, %v468_v42 }
  0xf7   : > { %v471_v44 = vsel %vm469_vm4, %v468_v42, %v470_v43 }
  0xf8   : > { %472 = vst [vmem:[%s204_s21] sm:$0xff] %v471_v44 }
  0xf9 PF: > { %s13_s16 = sadd.s32 1, %s758_s16   ;;  %s954_s12 = smov %s750_s14 }
  0xfa   : > { %p10_p7 = scmp.ge.s32.totalorder %s13_s16, 6   ;;  %s955_s13 = smov %s754_s15 }
  0xfb   : > { %s956_s14 = smov %s959_s17  ;;  %s957_s15 = smov %s963_s18 }
  0xfc   :  { %12 = sbr.rel (!%p10_p7) target bundleno = 3 (0x3), region = 64 }

</bundles_post_ra>
